<compile_context>
chip_gen: v7x
topology: tpu7x:2x2x1
jax: 0.10.0
libtpu: 0.0.40
codegen_flags: <defaults>
</compile_context>

<pallas_src>
import functools

import jax
import jax.numpy as jnp
from jax.experimental import pallas as pl
from jax.experimental.pallas import tpu as pltpu

LANE = 128  # lane width: weight N dims / outputs are zero-padded to multiples of this


def _round_up(x, m):
    return ((x + m - 1) // m) * m


# ----------------------------- Pallas kernel -----------------------------

def tabular_embedding_kernel(*refs, n_hidden, pad_rd, pad_cd):
    """Fused TabularEmbedding forward over one batch tile.

    refs layout (inputs, then outputs):
      val_real (TB,R) f32, x_sel (TB,R+2C) f32,
      m0 (R,P0) bf16, b0 (1,P0) f32,
      [bd_k (P_{k-1},P_k) bf16, b_k (1,P_k) f32] * n_hidden,
      bd_out (P_last,PAD_RD) bf16, w_sel (R+2C, PAD_RD+2*PAD_CD) bf16,
      fill_real (1,PAD_RD) f32, fill_cat (1,PAD_CD) f32,
      out_real (TB,PAD_RD) f32, out_cat (TB,PAD_CD) f32.
    """
    vr_ref, xsel_ref, m0_ref, b0_ref = refs[0:4]
    pos = 4
    hidden = []
    for _ in range(n_hidden):
        hidden.append((refs[pos], refs[pos + 1]))
        pos += 2
    bdo_ref, wsel_ref, fr_ref, fc_ref, or_ref, oc_ref = refs[pos:pos + 6]

    def mm(a, w_ref):
        # bf16 operands, f32 accumulation on the MXU.
        return jnp.dot(a.astype(jnp.bfloat16), w_ref[...],
                       preferred_element_type=jnp.float32)

    # --- real-feature FeatureNets, batched via block-diagonal (lane-padded) weights ---
    h = jnp.maximum(mm(vr_ref[...], m0_ref) + b0_ref[...], 0.0)       # (TB, P0)
    for bd_ref, b_ref in hidden:                                       # Dropout = identity (eval)
        h = jnp.maximum(mm(h, bd_ref) + b_ref[...], 0.0)
    feat_real = mm(h, bdo_ref)                                         # (TB, PAD_RD)

    # --- ONE fused matmul for cat features + both mask expansions -------------------
    sel = mm(xsel_ref[...], wsel_ref)                                  # (TB, PAD_RD+2*PAD_CD)
    mreal = sel[:, :pad_rd]                                            # 128-aligned slices
    feat_cat = sel[:, pad_rd:pad_rd + pad_cd]
    mcat = sel[:, pad_rd + pad_cd:]

    # --- missing blend:  fill + (feat - fill) * m   (== feat*m + fill*(1-m)) --------
    fr = fr_ref[...]
    fc = fc_ref[...]
    or_ref[...] = fr + (feat_real - fr) * mreal                        # lane-dense stores
    oc_ref[...] = fc + (feat_cat - fc) * mcat


# ----------------------------- one-time parameter prep -----------------------------

def _pad_cols(a, n):
    return jnp.pad(a, ((0, 0), (0, n - a.shape[1])))


def _block_diag_pad(stack, pad_rows, pad_cols):
    """(R, Hi, Ho) per-feature weights -> (pad_rows, pad_cols) block-diagonal matrix."""
    r_feat, hi, ho = stack.shape
    m = jnp.zeros((pad_rows, pad_cols), stack.dtype)
    for r in range(r_feat):
        m = m.at[r * hi:(r + 1) * hi, r * ho:(r + 1) * ho].set(stack[r])
    return m


def prepare_kernel_params(params, idx_real, idx_cat, lane=LANE):
    """Build block-diagonal, lane-padded, bf16 weights ONCE at model init."""
    R, C = len(idx_real), len(idx_cat)
    D = params["cat_linear"].shape[1]

    kp = {}
    h0 = params["w_in"].shape[1]
    p0 = _round_up(R * h0, lane)
    kp["m0"] = _block_diag_pad(params["w_in"][:, None, :], R, p0).astype(jnp.bfloat16)
    kp["b0"] = _pad_cols(params["b_in"].reshape(1, R * h0), p0)

    hidden = []
    prev_pad = p0
    for wh, bh in zip(params["w_hidden"], params["b_hidden"]):
        _, _, ho = wh.shape
        pk = _round_up(R * ho, lane)
        hidden.append((_block_diag_pad(wh, prev_pad, pk).astype(jnp.bfloat16),
                       _pad_cols(bh.reshape(1, R * ho), pk)))
        prev_pad = pk
    kp["hidden"] = tuple(hidden)

    pad_rd = _round_up(R * D, lane)
    pad_cd = _round_up(C * D, lane)
    kp["bd_out"] = _block_diag_pad(params["w_out"], prev_pad, pad_rd).astype(jnp.bfloat16)

    # Fused selector weight:  [miss_real | val_cat | miss_cat] (K = R+2C)
    #   -> [mreal (pad_rd) | feat_cat (pad_cd) | mcat (pad_cd)]
    wsel = jnp.zeros((R + 2 * C, pad_rd + 2 * pad_cd), jnp.float32)
    for r in range(R):
        wsel = wsel.at[r, r * D:(r + 1) * D].set(1.0)
    for c in range(C):
        wsel = wsel.at[R + c, pad_rd + c * D:pad_rd + (c + 1) * D].set(params["cat_linear"][c])
        wsel = wsel.at[R + C + c,
                       pad_rd + pad_cd + c * D:pad_rd + pad_cd + (c + 1) * D].set(1.0)
    kp["w_sel"] = wsel.astype(jnp.bfloat16)

    kp["fill_real"] = _pad_cols(params["missing_emb"][C:].reshape(1, R * D), pad_rd)
    kp["fill_cat"] = _pad_cols(params["missing_emb"][:C].reshape(1, C * D), pad_cd)
    return kp


# ----------------------------- forward wrapper -----------------------------

@functools.partial(jax.jit, static_argnames=("idx_real", "idx_cat", "out_features"))
def tabular_embedding(values, is_missing, kp, *, idx_real, idx_cat, out_features):
    B = values.shape[0]
    R, C, D = len(idx_real), len(idx_cat), out_features
    n_hidden = len(kp["hidden"])
    pad_rd = kp["fill_real"].shape[1]
    pad_cd = kp["fill_cat"].shape[1]

    # Column gather (layout plumbing) wrapper-side.
    ir = jnp.asarray(idx_real, jnp.int32)
    ic = jnp.asarray(idx_cat, jnp.int32)
    val_real = values[:, ir]                                            # (B, R)
    x_sel = jnp.concatenate(
        [is_missing[:, ir], values[:, ic], is_missing[:, ic]], axis=1)  # (B, R+2C)

    # Batch tiling: sublane-aligned tile, batch zero-padded to a tile multiple.
    tb = min(128, _round_up(B, 8))
    b_pad = _round_up(B, tb)
    if b_pad != B:
        val_real = jnp.pad(val_real, ((0, b_pad - B), (0, 0)))
        x_sel = jnp.pad(x_sel, ((0, b_pad - B), (0, 0)))

    const_args = [kp["m0"], kp["b0"]]
    for bd, bb in kp["hidden"]:
        const_args += [bd, bb]
    const_args += [kp["bd_out"], kp["w_sel"], kp["fill_real"], kp["fill_cat"]]

    data_specs = [
        pl.BlockSpec((tb, R), lambda i: (i, 0)),
        pl.BlockSpec((tb, R + 2 * C), lambda i: (i, 0)),
    ]
    const_specs = [pl.BlockSpec(a.shape, lambda i: (0, 0)) for a in const_args]

    kernel = functools.partial(tabular_embedding_kernel, n_hidden=n_hidden,
                               pad_rd=pad_rd, pad_cd=pad_cd)

    # Cost estimate (lets XLA schedule the custom call against wrapper-side ops).
    flops = 2 * b_pad * R * kp["m0"].shape[1]
    prev = kp["m0"].shape[1]
    for bd, _ in kp["hidden"]:
        flops += 2 * b_pad * prev * bd.shape[1]
        prev = bd.shape[1]
    flops += 2 * b_pad * prev * pad_rd
    flops += 2 * b_pad * (R + 2 * C) * kp["w_sel"].shape[1]
    const_bytes = sum(int(a.size) * a.dtype.itemsize for a in const_args)
    io_bytes = b_pad * (2 * R + 2 * C) * 4 + b_pad * (pad_rd + pad_cd) * 4
    cost = pl.CostEstimate(flops=int(flops), transcendentals=0,
                           bytes_accessed=int(const_bytes + io_bytes))

    # VMEM budget: resident weights + double-buffered batch tiles.  Only raise the
    # scoped limit when the estimate exceeds the default, capped below v7x's 64 MiB.
    tile_bytes = tb * (2 * R + 2 * C) * 4 + tb * (pad_rd + pad_cd) * 4
    vmem_est = 2 * const_bytes + 2 * tile_bytes + (1 << 20)
    ckw = dict(dimension_semantics=("parallel",))
    if vmem_est > (32 << 20):
        ckw["vmem_limit_bytes"] = int(min(vmem_est, 60 << 20))

    out_r, out_c = pl.pallas_call(
        kernel,
        out_shape=(jax.ShapeDtypeStruct((b_pad, pad_rd), jnp.float32),
                   jax.ShapeDtypeStruct((b_pad, pad_cd), jnp.float32)),
        grid=(b_pad // tb,),
        in_specs=data_specs + const_specs,
        out_specs=(pl.BlockSpec((tb, pad_rd), lambda i: (i, 0)),
                   pl.BlockSpec((tb, pad_cd), lambda i: (i, 0))),
        compiler_params=pltpu.CompilerParams(**ckw),
        cost_estimate=cost,
    )(val_real, x_sel, *const_args)

    # Lane-dense padded slabs -> (B, n_features, D): wrapper-side slice/reshape only.
    out_real = out_r[:B, :R * D].reshape(B, R, D)
    out_cat = out_c[:B, :C * D].reshape(B, C, D)
    return jnp.concatenate([out_real, out_cat], axis=1)


# ----------------------------- params & reference -----------------------------

def init_params(key, idx_real, idx_cat, out_features, hidden_units):
    R, C, D = len(idx_real), len(idx_cat), out_features
    n_hidden = len(hidden_units) - 1
    keys = jax.random.split(key, 5 + 2 * n_hidden)
    H0 = hidden_units[0]
    p = {
        "w_in": 0.3 * jax.random.normal(keys[0], (R, H0), jnp.float32),
        "b_in": 0.1 * jax.random.normal(keys[1], (R, H0), jnp.float32),
        "w_hidden": [],
        "b_hidden": [],
    }
    prev = H0
    ki = 2
    for h in hidden_units[1:]:
        p["w_hidden"].append(
            (1.0 / jnp.sqrt(prev)) * jax.random.normal(keys[ki], (R, prev, h), jnp.float32))
        p["b_hidden"].append(0.1 * jax.random.normal(keys[ki + 1], (R, h), jnp.float32))
        ki += 2
        prev = h
    p["w_out"] = (1.0 / jnp.sqrt(prev)) * jax.random.normal(keys[ki], (R, prev, D), jnp.float32)
    p["cat_linear"] = 0.5 * jax.random.normal(keys[ki + 1], (C, D), jnp.float32)
    p["missing_emb"] = 0.5 * jax.random.normal(keys[ki + 2], (R + C, D), jnp.float32)
    return p


def reference_forward(values, is_missing, params, idx_real, idx_cat):
    """Pure-JAX mirror of the PyTorch forward (eval mode), for validation."""
    ir = jnp.asarray(idx_real)
    ic = jnp.asarray(idx_cat)
    val_real, miss_real = values[:, ir], is_missing[:, ir]
    val_cat, miss_cat = values[:, ic], is_missing[:, ic]
    R, C = len(idx_real), len(idx_cat)

    feats = []
    for r in range(R):
        x = val_real[:, r:r + 1]                                              # (B,1)
        h = jax.nn.relu(x * params["w_in"][r][None, :] + params["b_in"][r][None, :])
        for wh, bh in zip(params["w_hidden"], params["b_hidden"]):
            h = jax.nn.relu(h @ wh[r] + bh[r][None, :])
        feats.append(h @ params["w_out"][r])
    features_real = jnp.stack(feats, axis=1)                                   # (B,R,D)
    features_cat = params["cat_linear"][None] * val_cat[..., None]             # (B,C,D)

    features_real = features_real * miss_real[..., None]
    features_cat = features_cat * miss_cat[..., None]
    fill_real = params["missing_emb"][C:][None, :, :] * (1.0 - miss_real[..., None])
    fill_cat = params["missing_emb"][:C][None, :, :] * (1.0 - miss_cat[..., None])
    return jnp.concatenate([features_real + fill_real, features_cat + fill_cat], axis=1)


# ----------------------------- main -----------------------------

if __name__ == "__main__":
    B = 4
    N_COLS = 12
    IDX_REAL = (0, 3, 5, 7, 9, 11)   # R = 6
    IDX_CAT = (1, 2, 4, 8)           # C = 4
    D = 16
    HIDDEN_UNITS = (32, 32)

    key = jax.random.PRNGKey(0)
    k_val, k_miss, k_par = jax.random.split(key, 3)
    values = jax.random.normal(k_val, (B, N_COLS), jnp.float32)
    is_missing = jax.random.bernoulli(k_miss, 0.7, (B, N_COLS)).astype(jnp.float32)
    params = init_params(k_par, IDX_REAL, IDX_CAT, D, HIDDEN_UNITS)

    # Hoisted out of the per-call path: block-diag / lane-pad / bf16 cast once at init.
    kp = prepare_kernel_params(params, IDX_REAL, IDX_CAT)

    out = tabular_embedding(values, is_missing, kp,
                            idx_real=IDX_REAL, idx_cat=IDX_CAT, out_features=D)
    out = jax.block_until_ready(out)

    ref = reference_forward(values, is_missing, params, IDX_REAL, IDX_CAT)
    assert out.shape == (B, len(IDX_REAL) + len(IDX_CAT), D)
    max_err = float(jnp.max(jnp.abs(out - ref)))
    assert jnp.allclose(out, ref, atol=1e-2, rtol=1e-2), f"max |err| = {max_err}"
    print("KERNEL_OK")
</pallas_src>

<mosaic_0001>
module attributes {stable_mosaic.version = 11 : i64} {
  func.func @tabular_embedding_kernel(%arg0: i32, %arg1: memref<8x6xf32, #tpu.memory_space<vmem>>, %arg2: memref<8x14xf32, #tpu.memory_space<vmem>>, %arg3: memref<6x256xbf16, #tpu.memory_space<vmem>>, %arg4: memref<1x256xf32, #tpu.memory_space<vmem>>, %arg5: memref<256x256xbf16, #tpu.memory_space<vmem>>, %arg6: memref<1x256xf32, #tpu.memory_space<vmem>>, %arg7: memref<256x128xbf16, #tpu.memory_space<vmem>>, %arg8: memref<14x384xbf16, #tpu.memory_space<vmem>>, %arg9: memref<1x128xf32, #tpu.memory_space<vmem>>, %arg10: memref<1x128xf32, #tpu.memory_space<vmem>>, %arg11: memref<8x128xf32, #tpu.memory_space<vmem>>, %arg12: memref<8x128xf32, #tpu.memory_space<vmem>>) attributes {dimension_semantics = [#tpu.dimension_semantics<parallel>], iteration_bounds = array<i64: 1>, scalar_prefetch = 0 : i64, scratch_operands = 0 : i64, tpu.core_type = #tpu.core_type<tc>, window_params = [{transform_indices = @transform_0, window_bounds = array<i64: 8, 6>}, {transform_indices = @transform_1, window_bounds = array<i64: 8, 14>}, {pipeline_mode = #tpu.pipeline_mode<synchronous>, transform_indices = @transform_2, window_bounds = array<i64: 6, 256>}, {pipeline_mode = #tpu.pipeline_mode<synchronous>, transform_indices = @transform_3, window_bounds = array<i64: 1, 256>}, {pipeline_mode = #tpu.pipeline_mode<synchronous>, transform_indices = @transform_4, window_bounds = array<i64: 256, 256>}, {pipeline_mode = #tpu.pipeline_mode<synchronous>, transform_indices = @transform_5, window_bounds = array<i64: 1, 256>}, {pipeline_mode = #tpu.pipeline_mode<synchronous>, transform_indices = @transform_6, window_bounds = array<i64: 256, 128>}, {pipeline_mode = #tpu.pipeline_mode<synchronous>, transform_indices = @transform_7, window_bounds = array<i64: 14, 384>}, {pipeline_mode = #tpu.pipeline_mode<synchronous>, transform_indices = @transform_8, window_bounds = array<i64: 1, 128>}, {pipeline_mode = #tpu.pipeline_mode<synchronous>, transform_indices = @transform_9, window_bounds = array<i64: 1, 128>}, {transform_indices = @transform_10, window_bounds = array<i64: 8, 128>}, {transform_indices = @transform_11, window_bounds = array<i64: 8, 128>}]} {
    %c0 = arith.constant 0 : index
    %c0_0 = arith.constant 0 : index
    %0 = vector.load %arg1[%c0, %c0_0] : memref<8x6xf32, #tpu.memory_space<vmem>>, vector<8x6xf32>
    %1 = arith.truncf %0 : vector<8x6xf32> to vector<8x6xbf16>
    %c0_1 = arith.constant 0 : index
    %c0_2 = arith.constant 0 : index
    %2 = vector.load %arg3[%c0_1, %c0_2] : memref<6x256xbf16, #tpu.memory_space<vmem>>, vector<6x256xbf16>
    %cst = arith.constant dense<0.000000e+00> : vector<8x256xf32>
    %3 = tpu.matmul %1, %2, %cst {dimension_numbers = #tpu.dot_dimension_numbers<[1], [0], [0], [1], [0, 0, 1, 1], [], []>} : vector<8x6xbf16>, vector<6x256xbf16>, vector<8x256xf32> -> vector<8x256xf32>
    %c0_3 = arith.constant 0 : index
    %c0_4 = arith.constant 0 : index
    %4 = vector.load %arg4[%c0_3, %c0_4] : memref<1x256xf32, #tpu.memory_space<vmem>>, vector<1x256xf32>
    %5 = vector.broadcast %4 : vector<1x256xf32> to vector<8x256xf32>
    %6 = arith.addf %3, %5 : vector<8x256xf32>
    %cst_5 = arith.constant 0.000000e+00 : f32
    %7 = vector.broadcast %cst_5 : f32 to vector<8x256xf32>
    %8 = arith.maximumf %6, %7 : vector<8x256xf32>
    %9 = arith.truncf %8 : vector<8x256xf32> to vector<8x256xbf16>
    %c0_6 = arith.constant 0 : index
    %c0_7 = arith.constant 0 : index
    %10 = vector.load %arg5[%c0_6, %c0_7] : memref<256x256xbf16, #tpu.memory_space<vmem>>, vector<256x256xbf16>
    %cst_8 = arith.constant dense<0.000000e+00> : vector<8x256xf32>
    %11 = tpu.matmul %9, %10, %cst_8 {dimension_numbers = #tpu.dot_dimension_numbers<[1], [0], [0], [1], [0, 0, 1, 1], [], []>} : vector<8x256xbf16>, vector<256x256xbf16>, vector<8x256xf32> -> vector<8x256xf32>
    %c0_9 = arith.constant 0 : index
    %c0_10 = arith.constant 0 : index
    %12 = vector.load %arg6[%c0_9, %c0_10] : memref<1x256xf32, #tpu.memory_space<vmem>>, vector<1x256xf32>
    %13 = vector.broadcast %12 : vector<1x256xf32> to vector<8x256xf32>
    %14 = arith.addf %11, %13 : vector<8x256xf32>
    %cst_11 = arith.constant 0.000000e+00 : f32
    %15 = vector.broadcast %cst_11 : f32 to vector<8x256xf32>
    %16 = arith.maximumf %14, %15 : vector<8x256xf32>
    %17 = arith.truncf %16 : vector<8x256xf32> to vector<8x256xbf16>
    %c0_12 = arith.constant 0 : index
    %c0_13 = arith.constant 0 : index
    %18 = vector.load %arg7[%c0_12, %c0_13] : memref<256x128xbf16, #tpu.memory_space<vmem>>, vector<256x128xbf16>
    %cst_14 = arith.constant dense<0.000000e+00> : vector<8x128xf32>
    %19 = tpu.matmul %17, %18, %cst_14 {dimension_numbers = #tpu.dot_dimension_numbers<[1], [0], [0], [1], [0, 0, 1, 1], [], []>} : vector<8x256xbf16>, vector<256x128xbf16>, vector<8x128xf32> -> vector<8x128xf32>
    %c0_15 = arith.constant 0 : index
    %c0_16 = arith.constant 0 : index
    %20 = vector.load %arg2[%c0_15, %c0_16] : memref<8x14xf32, #tpu.memory_space<vmem>>, vector<8x14xf32>
    %21 = arith.truncf %20 : vector<8x14xf32> to vector<8x14xbf16>
    %c0_17 = arith.constant 0 : index
    %c0_18 = arith.constant 0 : index
    %22 = vector.load %arg8[%c0_17, %c0_18] : memref<14x384xbf16, #tpu.memory_space<vmem>>, vector<14x384xbf16>
    %cst_19 = arith.constant dense<0.000000e+00> : vector<8x384xf32>
    %23 = tpu.matmul %21, %22, %cst_19 {dimension_numbers = #tpu.dot_dimension_numbers<[1], [0], [0], [1], [0, 0, 1, 1], [], []>} : vector<8x14xbf16>, vector<14x384xbf16>, vector<8x384xf32> -> vector<8x384xf32>
    %24 = vector.extract_strided_slice %23 {offsets = [0, 0], sizes = [8, 128], strides = [1, 1]} : vector<8x384xf32> to vector<8x128xf32>
    %25 = vector.extract_strided_slice %23 {offsets = [0, 128], sizes = [8, 128], strides = [1, 1]} : vector<8x384xf32> to vector<8x128xf32>
    %26 = vector.extract_strided_slice %23 {offsets = [0, 256], sizes = [8, 128], strides = [1, 1]} : vector<8x384xf32> to vector<8x128xf32>
    %c0_20 = arith.constant 0 : index
    %c0_21 = arith.constant 0 : index
    %27 = vector.load %arg9[%c0_20, %c0_21] : memref<1x128xf32, #tpu.memory_space<vmem>>, vector<1x128xf32>
    %c0_22 = arith.constant 0 : index
    %c0_23 = arith.constant 0 : index
    %28 = vector.load %arg10[%c0_22, %c0_23] : memref<1x128xf32, #tpu.memory_space<vmem>>, vector<1x128xf32>
    %29 = vector.broadcast %27 : vector<1x128xf32> to vector<8x128xf32>
    %30 = arith.subf %19, %29 : vector<8x128xf32>
    %31 = arith.mulf %30, %24 : vector<8x128xf32>
    %32 = vector.broadcast %27 : vector<1x128xf32> to vector<8x128xf32>
    %33 = arith.addf %32, %31 : vector<8x128xf32>
    %c0_24 = arith.constant 0 : index
    %c0_25 = arith.constant 0 : index
    %34 = vector.load %arg11[%c0_24, %c0_25] : memref<8x128xf32, #tpu.memory_space<vmem>>, vector<8x128xf32>
    tpu.vector_store %arg11[%c0_24, %c0_25], %33 {strides = array<i32>} : memref<8x128xf32, #tpu.memory_space<vmem>>, vector<8x128xf32>,
    %35 = vector.broadcast %28 : vector<1x128xf32> to vector<8x128xf32>
    %36 = arith.subf %25, %35 : vector<8x128xf32>
    %37 = arith.mulf %36, %26 : vector<8x128xf32>
    %38 = vector.broadcast %28 : vector<1x128xf32> to vector<8x128xf32>
    %39 = arith.addf %38, %37 : vector<8x128xf32>
    %c0_26 = arith.constant 0 : index
    %c0_27 = arith.constant 0 : index
    %40 = vector.load %arg12[%c0_26, %c0_27] : memref<8x128xf32, #tpu.memory_space<vmem>>, vector<8x128xf32>
    tpu.vector_store %arg12[%c0_26, %c0_27], %39 {strides = array<i32>} : memref<8x128xf32, #tpu.memory_space<vmem>>, vector<8x128xf32>,
    return
  }
  func.func @transform_0(%arg0: i32) -> (i32, i32) {
    %c0_i32 = arith.constant 0 : i32
    %c0_i32_0 = arith.constant 0 : i32
    return %arg0, %c0_i32 : i32, i32
  }
  func.func @transform_1(%arg0: i32) -> (i32, i32) {
    %c0_i32 = arith.constant 0 : i32
    %c0_i32_0 = arith.constant 0 : i32
    return %arg0, %c0_i32 : i32, i32
  }
  func.func @transform_2(%arg0: i32) -> (i32, i32) {
    %c0_i32 = arith.constant 0 : i32
    %c0_i32_0 = arith.constant 0 : i32
    %c0_i32_1 = arith.constant 0 : i32
    return %c0_i32, %c0_i32_0 : i32, i32
  }
  func.func @transform_3(%arg0: i32) -> (i32, i32) {
    %c0_i32 = arith.constant 0 : i32
    %c0_i32_0 = arith.constant 0 : i32
    %c0_i32_1 = arith.constant 0 : i32
    return %c0_i32, %c0_i32_0 : i32, i32
  }
  func.func @transform_4(%arg0: i32) -> (i32, i32) {
    %c0_i32 = arith.constant 0 : i32
    %c0_i32_0 = arith.constant 0 : i32
    %c0_i32_1 = arith.constant 0 : i32
    return %c0_i32, %c0_i32_0 : i32, i32
  }
  func.func @transform_5(%arg0: i32) -> (i32, i32) {
    %c0_i32 = arith.constant 0 : i32
    %c0_i32_0 = arith.constant 0 : i32
    %c0_i32_1 = arith.constant 0 : i32
    return %c0_i32, %c0_i32_0 : i32, i32
  }
  func.func @transform_6(%arg0: i32) -> (i32, i32) {
    %c0_i32 = arith.constant 0 : i32
    %c0_i32_0 = arith.constant 0 : i32
    %c0_i32_1 = arith.constant 0 : i32
    return %c0_i32, %c0_i32_0 : i32, i32
  }
  func.func @transform_7(%arg0: i32) -> (i32, i32) {
    %c0_i32 = arith.constant 0 : i32
    %c0_i32_0 = arith.constant 0 : i32
    %c0_i32_1 = arith.constant 0 : i32
    return %c0_i32, %c0_i32_0 : i32, i32
  }
  func.func @transform_8(%arg0: i32) -> (i32, i32) {
    %c0_i32 = arith.constant 0 : i32
    %c0_i32_0 = arith.constant 0 : i32
    %c0_i32_1 = arith.constant 0 : i32
    return %c0_i32, %c0_i32_0 : i32, i32
  }
  func.func @transform_9(%arg0: i32) -> (i32, i32) {
    %c0_i32 = arith.constant 0 : i32
    %c0_i32_0 = arith.constant 0 : i32
    %c0_i32_1 = arith.constant 0 : i32
    return %c0_i32, %c0_i32_0 : i32, i32
  }
  func.func @transform_10(%arg0: i32) -> (i32, i32) {
    %c0_i32 = arith.constant 0 : i32
    %c0_i32_0 = arith.constant 0 : i32
    return %arg0, %c0_i32 : i32, i32
  }
  func.func @transform_11(%arg0: i32) -> (i32, i32) {
    %c0_i32 = arith.constant 0 : i32
    %c0_i32_0 = arith.constant 0 : i32
    return %arg0, %c0_i32 : i32, i32
  }
}

</mosaic_0001>

<bundles_post_ra>
// kernel: tabular_embedding.1
= control target key start
LH: loop header
LB: loop body
LE: loop exit
PB: predicated region body
PF: predicated region fallthrough
CT: control target
= control target key end

     0   :  { %17 = vsyncpa [#allocation3], 0  ;;  %s880_s17 = smov [#allocation2]   ;;  %s1095_s0 = inlined_call_operand.vmem [shape: f32[8,6], index: 0, kind: input, shape index: {}]   ;;  %s1096_s1 = inlined_call_operand.vmem [shape: f32[8,14], index: 1, kind: input, shape index: {}]   ;;  %s1097_s2 = inlined_call_operand.vmem [shape: bf16[6,256], index: 2, kind: input, shape index: {}]   ;;  %s1098_s3 = inlined_call_operand.vmem [shape: f32[1,256], index: 3, kind: input, shape index: {}]   ;;  %s1099_s4 = inlined_call_operand.vmem [shape: bf16[256,256], index: 4, kind: input, shape index: {}]   ;;  %s1100_s5 = inlined_call_operand.vmem [shape: f32[1,256], index: 5, kind: input, shape index: {}]   ;;  %s1101_s6 = inlined_call_operand.hbm [shape: bf16[256,128], index: 6, kind: input, shape index: {}]   ;;  %s1102_s7 = inlined_call_operand.vmem [shape: bf16[14,384], index: 7, kind: input, shape index: {}]   ;;  %s1103_s8 = inlined_call_operand.vmem [shape: f32[1,128], index: 8, kind: input, shape index: {}]   ;;  %s1104_s9 = inlined_call_operand.vmem [shape: f32[1,128], index: 9, kind: input, shape index: {}]   ;;  %s1105_s10 = inlined_call_operand.vmem [shape: f32[8,128], index: 10, kind: output, shape index: {0}]   ;;  %s1106_s11 = inlined_call_operand.vmem [shape: f32[8,128], index: 11, kind: output, shape index: {1}]  }
   0x1   :  { %s35_s18 = sshll.u32 %s880_s17, 4  ;;  %s856_s21 = scalar_lea.hbm %s1101_s6, 2048  ;;  %s36_s18 = int_to_ptr.vmem [resolvable:$true] %s35_s18 }
   0x2   :  { %p857_p0 = scmp.ne.s32.totalorder %s1101_s6, %s856_s21  ;;  %p860_p1 = scmp.lt.u32.totalorder %s856_s21, %s1101_s6 }
   0x4   :  { %p862_p2 = pnand %p860_p1, %p857_p0 }
   0x6   :  { %865 = shalt.err (!%p862_p2)
}
   0x7   :  { %s866_s26 = scalar_lea.vmem %s36_s18, 2048  ;;  %p871_p4 = scmp.lt.s32.totalorder %s36_s18, %s36_s18 }
   0x8   :  { %p867_p3 = scmp.ne.s32.totalorder %s36_s18, %s866_s26  ;;  %p872_p5 = scmp.lt.s32.totalorder %s866_s26, %s866_s26 }
   0xa   :  { %p873_p6 = por %p872_p5, %p871_p4 }
   0xc   :  { %p874_p7 = pnand %p873_p6, %p867_p3 }
   0xe   :  { %877 = shalt.err (!%p874_p7)
}
   0xf   :  { %s881_s27 = smov 64   ;;  %s882_s28 = smov 4  }
  0x10   :  { %41 = dma.hbm_to_vmem [thread:$0]  %s1101_s6, 2048, %s36_s18, [#allocation3], %s881_s27, %s881_s27, %s882_s28  }
  0x11   :  { %878 = dma.done.wait [#allocation3], 2048  }
  0x12   :  { %879 = vsyncadd [#allocation3], 4294965248  ;;  %v883_v0 = vmov 0   ;;  %v54_v1 = vld [vmem:[%s1097_s2] sm:$0x77]  ;;  %vm76_vm0 = vcmask 1042432   ;;  %v57_v51 = vlaneseq }
  0x13   :  { %115 = vmatprep.mubr.bf16.mxu0 %v883_v0  ;;  %v52_v2 = vld [vmem:[%s1095_s0] sm:$0xff]  ;;  %v691_v3 = vcombine.high %v54_v1, %v54_v1  ;;  %v690_v4 = vcombine.low %v54_v1, %v54_v1  ;;  %v791_v7 = vld [vmem:[%s1099_s4 + $0x14] ss:$8 sps:$4 sm:$0xff]   ;;  %vm72_vm1 = vcmask 48128   ;;  %v793_v10 = vld [vmem:[%s1099_s4 + $0x10] ss:$8 sps:$4 sm:$0xff]  }
  0x14   :  { %v788_v5 = vld [vmem:[%s1099_s4 + $0x4] ss:$8 sps:$4 sm:$0xff]   ;;  %v790_v6 = vld [vmem:[%s1099_s4] ss:$8 sps:$4 sm:$0xff]   ;;  %v53_v9 = vpack.c.bf16 %v52_v2, %v52_v2  ;;  %v797_v13 = vld [vmem:[%s1099_s4 + $0x34] ss:$8 sps:$4 sm:$0xff]  }
  0x15   :  { %692 = vmatprep.subr.msk.bf16.mxu0 %vm76_vm0, %v691_v3  ;;  %v78_v8 = vsel %vm76_vm0, %v690_v4, 0  ;;  %332 = vmatprep.subr.bf16.mxu1 %v788_v5  ;;  %v794_v11 = vld [vmem:[%s1099_s4 + $0x24] ss:$8 sps:$4 sm:$0xff]   ;;  %v796_v12 = vld [vmem:[%s1099_s4 + $0x20] ss:$8 sps:$4 sm:$0xff]   ;;  %v840_v43 = vld [vmem:[#allocation2 + $0x50] sm:$0xff]  }
  0x16   :  { %84 = vmatpush1.bf16.msra.mxu0 %v78_v8  ;;  %333 = vmatpush1.bf16.msra.mxu1 %v790_v6  ;;  %v799_v14 = vld [vmem:[%s1099_s4 + $0x30] ss:$8 sps:$4 sm:$0xff]   ;;  %v800_v15 = vld [vmem:[%s1099_s4 + $0x44] ss:$8 sps:$4 sm:$0xff]   ;;  %v802_v16 = vld [vmem:[%s1099_s4 + $0x40] ss:$8 sps:$4 sm:$0xff]  }
  0x17   :  { %334 = vmatprep.subr.bf16.mxu1 %v791_v7  ;;  %v803_v17 = vld [vmem:[%s1099_s4 + $0x54] ss:$8 sps:$4 sm:$0xff]   ;;  %v805_v18 = vld [vmem:[%s1099_s4 + $0x50] ss:$8 sps:$4 sm:$0xff]   ;;  %v806_v19 = vld [vmem:[%s1099_s4 + $0x64] ss:$8 sps:$4 sm:$0xff]  }
  0x18   :  { %v808_v20 = vld [vmem:[%s1099_s4 + $0x60] ss:$8 sps:$4 sm:$0xff]   ;;  %v809_v21 = vld [vmem:[%s1099_s4 + $0x74] ss:$8 sps:$4 sm:$0xff]   ;;  %v811_v22 = vld [vmem:[%s1099_s4 + $0x70] ss:$8 sps:$4 sm:$0xff]  }
  0x19   :  { %693 = vmatmul.mubr.msk.bf16.vlgmr.msra.gmra.mrb[0].mxu0 %vm72_vm1, %v53_v9  ;;  %v812_v23 = vld [vmem:[%s1099_s4 + $0x84] ss:$8 sps:$4 sm:$0xff]   ;;  %v814_v24 = vld [vmem:[%s1099_s4 + $0x80] ss:$8 sps:$4 sm:$0xff]   ;;  %v815_v25 = vld [vmem:[%s1099_s4 + $0x94] ss:$8 sps:$4 sm:$0xff]  }
  0x1a   :  { %335 = vmatpush1.bf16.msra.mxu1 %v793_v10  ;;  %v817_v26 = vld [vmem:[%s1099_s4 + $0x90] ss:$8 sps:$4 sm:$0xff]   ;;  %v818_v27 = vld [vmem:[%s1099_s4 + $0xa4] ss:$8 sps:$4 sm:$0xff]   ;;  %v820_v28 = vld [vmem:[%s1099_s4 + $0xa0] ss:$8 sps:$4 sm:$0xff]  }
  0x1b   :  { %336 = vmatprep.subr.bf16.mxu1 %v794_v11  ;;  %v821_v29 = vld [vmem:[%s1099_s4 + $0xb4] ss:$8 sps:$4 sm:$0xff]   ;;  %v823_v30 = vld [vmem:[%s1099_s4 + $0xb0] ss:$8 sps:$4 sm:$0xff]   ;;  %v824_v31 = vld [vmem:[%s1099_s4 + $0xc4] ss:$8 sps:$4 sm:$0xff]  }
  0x1c   :  { %v826_v32 = vld [vmem:[%s1099_s4 + $0xc0] ss:$8 sps:$4 sm:$0xff]   ;;  %v827_v33 = vld [vmem:[%s1099_s4 + $0xd4] ss:$8 sps:$4 sm:$0xff]   ;;  %v829_v34 = vld [vmem:[%s1099_s4 + $0xd0] ss:$8 sps:$4 sm:$0xff]  }
  0x1d   :  { %v830_v35 = vld [vmem:[%s1099_s4 + $0xe4] ss:$8 sps:$4 sm:$0xff]   ;;  %v832_v36 = vld [vmem:[%s1099_s4 + $0xe0] ss:$8 sps:$4 sm:$0xff]   ;;  %v833_v37 = vld [vmem:[%s1099_s4 + $0xf4] ss:$8 sps:$4 sm:$0xff]  }
  0x1e   :  { %337 = vmatpush1.bf16.msra.mxu1 %v796_v12  ;;  %v835_v38 = vld [vmem:[%s1099_s4 + $0xf0] ss:$8 sps:$4 sm:$0xff]   ;;  %v836_v39 = vld [vmem:[#allocation2 + $0x40] sm:$0xff]   ;;  %v838_v41 = vld [vmem:[#allocation2 + $0x48] sm:$0xff]   ;;  %v58_v52 = vshrl.u32 %v57_v51, 7  ;;  %vm568_vm2 = vcmask 1046528  }
  0x1f   :  { %338 = vmatprep.subr.bf16.mxu1 %v797_v13  ;;  %v837_v40 = vld [vmem:[#allocation2] sm:$0xff]   ;;  %750 = vmatprep.subr.bf16.mxu0 %v836_v39  ;;  %v839_v42 = vld [vmem:[#allocation2 + $0x8] sm:$0xff]   ;;  %v841_v44 = vld [vmem:[#allocation2 + $0x10] sm:$0xff]   ;;  %vm564_vm3 = vcmask 113664   ;;  %vm885_vm4 = vmmov 0  }
  0x20   :  { %751 = vmatpush3.bf16.msra.mxu0 %v837_v40  ;;  %v842_v45 = vld [vmem:[#allocation2 + $0x58] sm:$0xff]   ;;  %v844_v47 = vld [vmem:[#allocation2 + $0x60] sm:$0xff]   ;;  %v846_v49 = vld [vmem:[#allocation2 + $0x68] sm:$0xff]   ;;  %v59_v53 = vsub.s32 0, %v58_v52  ;;  %v63_v55 = vsub.s32 1, %v58_v52 }
  0x21   :  { %752 = vmatprep.subr.bf16.mxu0 %v838_v41  ;;  %v843_v46 = vld [vmem:[#allocation2 + $0x18] sm:$0xff]   ;;  %v845_v48 = vld [vmem:[#allocation2 + $0x20] sm:$0xff]   ;;  %v847_v50 = vld [vmem:[#allocation2 + $0x28] sm:$0xff]  }
  0x22   :  { %339 = vmatpush1.bf16.msra.mxu1 %v799_v14  ;;  %v55_v54 = vld [vmem:[%s1098_s3] sm:$0x3]  ;;  %v848_v5 = vld [vmem:[#allocation2 + $0x70] sm:$0xff]   ;;  %v850_v7 = vld [vmem:[#allocation2 + $0x78] sm:$0xff]  }
  0x23   :  { %340 = vmatprep.subr.bf16.mxu1 %v800_v15  ;;  %v60_v56 = vrot.slane %v55_v54, %v59_v53  ;;  %v64_v57 = vrot.slane %v55_v54, %v63_v55  ;;  %v849_v6 = vld [vmem:[#allocation2 + $0x30] sm:$0xff]   ;;  %v851_v8 = vld [vmem:[#allocation2 + $0x38] sm:$0xff]   ;;  %v160_v10 = vld [vmem:[%s1100_s5] sm:$0x3] }
  0x24   :  { %753 = vmatpush3.bf16.msra.mxu0 %v839_v42  ;;  %v852_v9 = vld [vmem:[%s1102_s7 + $0x4] ss:$12 sps:$4 sm:$0x7f]   ;;  %v165_v11 = vrot.slane %v160_v10, %v59_v53  ;;  %v169_v12 = vrot.slane %v160_v10, %v63_v55  ;;  %v749_v42 = vld [vmem:[%s1104_s9] ss:$0 sm:$0xff] }
  0x25   :  { %754 = vmatprep.subr.bf16.mxu0 %v840_v43 }
  0x26   :  { %341 = vmatpush1.bf16.msra.mxu1 %v802_v16 }
  0x27   :  { %342 = vmatprep.subr.bf16.mxu1 %v803_v17 }
  0x28   :  { %755 = vmatpush3.bf16.msra.mxu0 %v841_v44 }
  0x29   :  { %756 = vmatprep.subr.bf16.mxu0 %v842_v45 }
  0x2a   :  { %343 = vmatpush1.bf16.msra.mxu1 %v805_v18 }
  0x2b   :  { %344 = vmatprep.subr.bf16.mxu1 %v806_v19 }
  0x2c   :  { %757 = vmatpush3.bf16.msra.mxu0 %v843_v46 }
  0x2d   :  { %758 = vmatprep.subr.bf16.mxu0 %v844_v47 }
  0x2e   :  { %345 = vmatpush1.bf16.msra.mxu1 %v808_v20  ;;  %v854_v20 = vld [vmem:[%s1102_s7] ss:$12 sps:$4 sm:$0x7f]  }
  0x2f   :  { %346 = vmatprep.subr.bf16.mxu1 %v809_v21 }
  0x30   :  { %759 = vmatpush3.bf16.msra.mxu0 %v845_v48 }
  0x31   :  { %760 = vmatprep.subr.bf16.mxu0 %v846_v49 }
  0x32   :  { %347 = vmatpush1.bf16.msra.mxu1 %v811_v22 }
  0x33   :  { %348 = vmatprep.subr.bf16.mxu1 %v812_v23 }
  0x34   :  { %761 = vmatpush3.bf16.msra.mxu0 %v847_v50 }
  0x35   :  { %762 = vmatprep.subr.bf16.mxu0 %v848_v5 }
  0x36   :  { %349 = vmatpush1.bf16.msra.mxu1 %v814_v24  ;;  %v570_v24 = vsel %vm568_vm2, %v854_v20, 0 }
  0x37   :  { %350 = vmatprep.subr.bf16.mxu1 %v815_v25  ;;  %v545_v25 = vld [vmem:[%s1096_s1] sm:$0xff] }
  0x38   :  { %763 = vmatpush3.bf16.msra.mxu0 %v849_v6 }
  0x39   :  { %764 = vmatprep.subr.bf16.mxu0 %v850_v7 }
  0x3a   :  { %351 = vmatpush1.bf16.msra.mxu1 %v817_v26  ;;  %v884_v26 = vmov 0.0  }
  0x3b   :  { %352 = vmatprep.subr.bf16.mxu1 %v818_v27  ;;  %v855_v27 = vld [vmem:[%s1102_s7 + $0x8] ss:$12 sps:$4 sm:$0x7f]  }
  0x3c   :  { %765 = vmatpush3.bf16.msra.mxu0 %v851_v8 }
  0x3d   :  { %745 = vmatprep.subr.msk.bf16.mxu0 %vm568_vm2, %v852_v9 }
  0x3e   :  { %353 = vmatpush1.bf16.msra.mxu1 %v820_v28  ;;  %v546_v28 = vpack.c.bf16 %v545_v25, %v545_v25 }
  0x3f   :  { %354 = vmatprep.subr.bf16.mxu1 %v821_v29  ;;  %v576_v29 = vsel %vm568_vm2, %v855_v27, 0 }
  0x42   :  { %355 = vmatpush1.bf16.msra.mxu1 %v823_v30 }
  0x43   :  { %356 = vmatprep.subr.bf16.mxu1 %v824_v31 }
  0x46   :  { %357 = vmatpush1.bf16.msra.mxu1 %v826_v32 }
  0x47   :  { %358 = vmatprep.subr.bf16.mxu1 %v827_v33 }
  0x4a   :  { %359 = vmatpush1.bf16.msra.mxu1 %v829_v34  ;;  %v748_v34 = vld [vmem:[%s1103_s8] ss:$0 sm:$0xff] }
  0x4b   :  { %360 = vmatprep.subr.bf16.mxu1 %v830_v35 }
  0x4e   :  { %361 = vmatpush1.bf16.msra.mxu1 %v832_v36 }
  0x4f   :  { %362 = vmatprep.subr.bf16.mxu1 %v833_v37 }
  0x52   :  { %363 = vmatpush1.bf16.msra.mxu1 %v835_v38 }
  0xec   :  { %v117_v58 = vpop.f32.mrb[0].mxu0 }
  0xed   :  { %v118_v59 = vadd.f32 %v117_v58, %v60_v56  ;;  %v119_v60 = vpop.f32.mrb[1].mxu0 }
  0xee   :  { %v120_v61 = vadd.f32 %v119_v60, %v64_v57  ;;  %v121_v62 = vpop.f32.mrb[2].mxu0 }
  0xef   :  { %v124_v63 = vmax.f32 %v118_v59, 0.0  ;;  %v122_v1 = vpop.f32.mrb[3].mxu0 }
  0xf0   :  { %v125_v2 = vmax.f32 %v120_v61, 0.0 }
  0xf1   :  { %v126_v4 = vpack.c.bf16 %v124_v63, %v124_v63 }
  0xf2   :  { %v127_v3 = vpack.c.bf16 %v125_v2, %v125_v2 }
  0xf4   :  { %364 = vmatprep.mubr.bf16.mxu1 %v127_v3 }
  0xf5   :  { %365 = vmatmul.mubr.bf16.vlgmr.msra.gmra.mrb[0].mxu1 %v126_v4 }
 0x1c8   :  { %v366_v13 = vpop.f32.mrb[0].mxu1 }
 0x1c9   :  { %v367_v14 = vadd.f32 %v366_v13, %v165_v11  ;;  %v368_v15 = vpop.f32.mrb[1].mxu1 }
 0x1ca   :  { %v369_v16 = vadd.f32 %v368_v15, %v169_v12  ;;  %v370_v17 = vpop.f32.mrb[2].mxu1 }
 0x1cb   :  { %v373_v18 = vmax.f32 %v367_v14, 0.0  ;;  %v371_v19 = vpop.f32.mrb[3].mxu1 }
 0x1cc   :  { %v374_v21 = vmax.f32 %v369_v16, 0.0 }
 0x1cd   :  { %v375_v23 = vpack.c.bf16 %v373_v18, %v373_v18 }
 0x1ce   :  { %v376_v22 = vpack.c.bf16 %v374_v21, %v374_v21 }
 0x1d0   :  { %537 = vmatprep.mubr.bf16.mxu0 %v376_v22 }
 0x1d1   :  { %538 = vmatmul.mubr.bf16.vlgmr.msra.gmra.mrb[4].mxu0 %v375_v23 }
 0x1d2   :  { %579 = vmatpush1.bf16.msra.mxu0 %v570_v24  ;;  %610 = vmatprep.mubr.bf16.mxu0 %v883_v0 }
 0x1d3   :  { %774 = vmatprep.subr.bf16.mxu0 %v884_v26 }
 0x1d9   :  { %746 = vmatmul.mubr.msk.bf16.vlgmr.msra.gmra.mrb[8].mxu0 %vm564_vm3, %v546_v28 }
 0x1da   :  { %775 = vmatpush3.bf16.msra.mxu0 %v576_v29  ;;  %776 = vmatprep.mubr.msk.bf16.mxu0 %vm885_vm4, %v884_v26 }
 0x1e1   :  { %777 = vmatmul.mubr.msk.bf16.vlgmr.msra.gmra.mrb[12].mxu0 %vm564_vm3, %v546_v28 }
 0x2a4   :  { %v766_v0 = vpop.f32.mrb[4].mxu0 }
 0x2a5   :  { %v767_v30 = vpop.f32.mrb[5].mxu0 }
 0x2a6   :  { %v768_v31 = vadd.f32 %v767_v30, %v766_v0  ;;  %v769_v32 = vpop.f32.mrb[6].mxu0 }
 0x2a7   :  { %v770_v33 = vpop.f32.mrb[7].mxu0 }
 0x2a8   :  { %v667_v35 = vsub.f32 %v768_v31, %v748_v34 }
 0x2ac   :  { %v612_v36 = vpop.f32.mrb[8].mxu0 }
 0x2ad   :  { %v668_v37 = vmul.f32 %v667_v35, %v612_v36  ;;  %v614_v38 = vpop.f32.mrb[9].mxu0 }
 0x2ae   :  { %v616_v39 = vpop.f32.mrb[10].mxu0  ;;  %v677_v43 = vsub.f32 %v614_v38, %v749_v42 }
 0x2af   :  { %v669_v40 = vadd.f32 %v748_v34, %v668_v37  ;;  %v617_v41 = vpop.f32.mrb[11].mxu0 }
 0x2b1   :  { %670 = vst [vmem:[%s1105_s10] sm:$0xff] %v669_v40 }
 0x2b4   :  { %v653_v44 = vpop.f32.mrb[12].mxu0 }
 0x2b5   :  { %v678_v45 = vmul.f32 %v677_v43, %v653_v44  ;;  %v778_v46 = vpop.f32.mrb[13].mxu0 }
 0x2b6   :  { %v656_v47 = vpop.f32.mrb[14].mxu0 }
 0x2b7   :  { %v679_v48 = vadd.f32 %v749_v42, %v678_v45  ;;  %v779_v49 = vpop.f32.mrb[15].mxu0 }
 0x2b9   :  { %680 = vst [vmem:[%s1106_s11] sm:$0xff] %v679_v48 }
 0x2ba   :  { %689 = vsyncpa [#allocation3], 1 }

</bundles_post_ra>
